<compile_context>
chip_gen: v7x
topology: tpu7x:2x2x1
jax: 0.10.0
libtpu: 0.0.40
codegen_flags: <defaults>
</compile_context>

<pallas_src>
import jax
import jax.numpy as jnp
from jax.experimental import pallas as pl
from jax.experimental.pallas import tpu as pltpu


def _round_up(x, m):
    return (x + m - 1) // m * m


def _critic_kernel(x_ref, w1_ref, b1_ref, w2_ref, b2_ref, o_ref):
    # Hidden layer on the MXU: (TB, D) @ (D, H) -> (TB, H), f32 accumulation.
    h = jnp.dot(x_ref[...], w1_ref[...], preferred_element_type=jnp.float32)
    h = h + b1_ref[...]                      # b1 is (1, H), broadcasts over rows
    # LeakyReLU (PyTorch default negative_slope = 0.01) on the VPU.
    h = jnp.where(h > 0, h, 0.01 * h)
    # Output layer has a single unit: an MXU matmul with N=1 would use 1/128
    # (v5e) or 1/256 (v6e/v7x) of the output columns and pay the full push/pop
    # latency, so do a VPU multiply with the (1, H) weight row and a cross-lane
    # reduction (XLU slot, off the MXU critical path).
    out = jnp.sum(h * w2_ref[...], axis=-1, keepdims=True)   # (TB, 1)
    out = out + b2_ref[0, 0]                 # scalar bias read from SMEM
    # Output is (TB, 1): lane-sparse, but output bytes are D x smaller than the
    # x stream, so we keep the simple block and avoid an in-kernel lane relayout.
    o_ref[...] = out.astype(o_ref.dtype)


def critic_forward(x, w1, b1, w2, b2, *, block_batch=1024):
    """Pallas forward for Critic: Linear -> LeakyReLU(0.01) -> Linear.

    x : (B, D) float32
    w1: (D, H), b1: (1, H)
    w2: (H, 1) or (1, H), b2: (1, 1)
    returns (B, 1) float32
    """
    B, D = x.shape
    H = w1.shape[1]
    w2_row = jnp.reshape(w2, (1, H))                 # lane-dense weight row for VPU path
    b2_s = jnp.reshape(b2, (1, 1)).astype(jnp.float32)

    # Batch tile: multiple of 8 sublanes, capped so the (TB, D) x-tile (which is
    # lane-padded to 128 in VMEM) plus intermediates and double buffering fit
    # comfortably in the default scoped VMEM on v5e/v6e/v7x.
    TB = min(block_batch, _round_up(B, 8))
    grid_b = pl.cdiv(B, TB)
    B_pad = grid_b * TB
    if B_pad != B:
        # Handle a ragged last tile by zero-padding; padded rows are sliced off below.
        x = jnp.pad(x, ((0, B_pad - B), (0, 0)))

    out = pl.pallas_call(
        _critic_kernel,
        out_shape=jax.ShapeDtypeStruct((B_pad, 1), jnp.float32),
        grid=(grid_b,),
        in_specs=[
            # x streams over the batch grid (Pallas double-buffers the tile DMA).
            pl.BlockSpec((TB, D), lambda i: (i, 0)),
            # Weights/biases are tiny: constant index_map -> DMA'd once, VMEM-resident.
            pl.BlockSpec((D, H), lambda i: (0, 0)),
            pl.BlockSpec((1, H), lambda i: (0, 0)),
            pl.BlockSpec((1, H), lambda i: (0, 0)),
            # (1, 1) scalar bias lives in SMEM: no padded (8,128) VMEM tile, no vreg.
            pl.BlockSpec(memory_space=pltpu.MemorySpace.SMEM),
        ],
        out_specs=pl.BlockSpec((TB, 1), lambda i: (i, 0)),
        compiler_params=pltpu.CompilerParams(
            # Batch tiles are independent: shards grid steps across both
            # TensorCores on v7x; harmless no-op on v5e/v6e.
            dimension_semantics=("parallel",),
        ),
    )(x, w1, b1, w2_row, b2_s)
    return out[:B]


def init_critic_params(key, state_dim, discrete_dim, continuous_dim, hidden_dim=64):
    """Deterministic init mimicking PyTorch nn.Linear default (uniform +-1/sqrt(fan_in))."""
    in_dim = state_dim + discrete_dim + continuous_dim
    k1, k2, k3, k4 = jax.random.split(key, 4)
    bound1 = 1.0 / jnp.sqrt(in_dim)
    bound2 = 1.0 / jnp.sqrt(hidden_dim)
    w1 = jax.random.uniform(k1, (in_dim, hidden_dim), jnp.float32, -bound1, bound1)
    b1 = jax.random.uniform(k2, (1, hidden_dim), jnp.float32, -bound1, bound1)
    w2 = jax.random.uniform(k3, (hidden_dim, 1), jnp.float32, -bound2, bound2)
    b2 = jax.random.uniform(k4, (1, 1), jnp.float32, -bound2, bound2)
    return w1, b1, w2, b2


def _reference(x, w1, b1, w2, b2):
    h = x @ w1 + b1
    h = jnp.where(h > 0, h, 0.01 * h)
    return h @ w2 + b2


if __name__ == "__main__":
    # Shapes consistent with the module: Critic(state_dim=10, discrete_dim=4,
    # continuous_dim=2, hidden_dim=32); batch of concatenated state+action vectors.
    state_dim, discrete_dim, continuous_dim, hidden_dim = 10, 4, 2, 32
    in_dim = state_dim + discrete_dim + continuous_dim

    key = jax.random.PRNGKey(0)
    kx, kp, kx2 = jax.random.split(key, 3)
    w1, b1, w2, b2 = init_critic_params(kp, state_dim, discrete_dim, continuous_dim, hidden_dim)

    # Small-batch check (single grid step).
    batch = 8
    x = jax.random.normal(kx, (batch, in_dim), jnp.float32)
    out = jax.block_until_ready(critic_forward(x, w1, b1, w2, b2))
    ref = _reference(x, w1, b1, w2, b2)
    assert out.shape == (batch, in_dim * 0 + 1)
    assert jnp.allclose(out, ref, atol=1e-5, rtol=1e-5)

    # Larger ragged batch: exercises the batch grid, parallel semantics, and the
    # zero-padding / slicing of the last tile.
    batch2 = 1000
    x2 = jax.random.normal(kx2, (batch2, in_dim), jnp.float32)
    out2 = jax.block_until_ready(critic_forward(x2, w1, b1, w2, b2, block_batch=256))
    ref2 = _reference(x2, w1, b1, w2, b2)
    assert out2.shape == (batch2, 1)
    assert jnp.allclose(out2, ref2, atol=1e-5, rtol=1e-5)

    print("KERNEL_OK")
</pallas_src>

<mosaic_0001>
module attributes {stable_mosaic.version = 11 : i64} {
  func.func @_critic_kernel(%arg0: i32, %arg1: memref<8x16xf32, #tpu.memory_space<vmem>>, %arg2: memref<16x32xf32, #tpu.memory_space<vmem>>, %arg3: memref<1x32xf32, #tpu.memory_space<vmem>>, %arg4: memref<1x32xf32, #tpu.memory_space<vmem>>, %arg5: memref<1x1xf32, #tpu.memory_space<smem>>, %arg6: memref<8x1xf32, #tpu.memory_space<vmem>>) attributes {dimension_semantics = [#tpu.dimension_semantics<parallel>], iteration_bounds = array<i64: 1>, scalar_prefetch = 0 : i64, scratch_operands = 0 : i64, tpu.core_type = #tpu.core_type<tc>, window_params = [{transform_indices = @transform_0, window_bounds = array<i64: 8, 16>}, {pipeline_mode = #tpu.pipeline_mode<synchronous>, transform_indices = @transform_1, window_bounds = array<i64: 16, 32>}, {pipeline_mode = #tpu.pipeline_mode<synchronous>, transform_indices = @transform_2, window_bounds = array<i64: 1, 32>}, {pipeline_mode = #tpu.pipeline_mode<synchronous>, transform_indices = @transform_3, window_bounds = array<i64: 1, 32>}, {transform_indices = @transform_4, window_bounds = array<i64: 1, 1>}, {transform_indices = @transform_5, window_bounds = array<i64: 8, 1>}]} {
    %c0 = arith.constant 0 : index
    %c0_0 = arith.constant 0 : index
    %0 = vector.load %arg1[%c0, %c0_0] : memref<8x16xf32, #tpu.memory_space<vmem>>, vector<8x16xf32>
    %c0_1 = arith.constant 0 : index
    %c0_2 = arith.constant 0 : index
    %1 = vector.load %arg2[%c0_1, %c0_2] : memref<16x32xf32, #tpu.memory_space<vmem>>, vector<16x32xf32>
    %cst = arith.constant dense<0.000000e+00> : vector<8x32xf32>
    %2 = tpu.matmul %0, %1, %cst {dimension_numbers = #tpu.dot_dimension_numbers<[1], [0], [0], [1], [0, 0, 1, 1], [], []>} : vector<8x16xf32>, vector<16x32xf32>, vector<8x32xf32> -> vector<8x32xf32>
    %c0_3 = arith.constant 0 : index
    %c0_4 = arith.constant 0 : index
    %3 = vector.load %arg3[%c0_3, %c0_4] : memref<1x32xf32, #tpu.memory_space<vmem>>, vector<1x32xf32>
    %4 = vector.broadcast %3 : vector<1x32xf32> to vector<8x32xf32>
    %5 = arith.addf %2, %4 : vector<8x32xf32>
    %cst_5 = arith.constant 0.000000e+00 : f32
    %6 = vector.broadcast %cst_5 : f32 to vector<8x32xf32>
    %7 = arith.cmpf ogt, %5, %6 : vector<8x32xf32>
    %cst_6 = arith.constant 0.00999999977 : f32
    %8 = vector.broadcast %cst_6 : f32 to vector<8x32xf32>
    %9 = arith.mulf %8, %5 : vector<8x32xf32>
    %10 = arith.select %7, %5, %9 : vector<8x32xi1>, vector<8x32xf32>
    %c0_7 = arith.constant 0 : index
    %c0_8 = arith.constant 0 : index
    %11 = vector.load %arg4[%c0_7, %c0_8] : memref<1x32xf32, #tpu.memory_space<vmem>>, vector<1x32xf32>
    %12 = vector.broadcast %11 : vector<1x32xf32> to vector<8x32xf32>
    %13 = arith.mulf %10, %12 : vector<8x32xf32>
    %cst_9 = arith.constant dense<0.000000e+00> : vector<8xf32>
    %14 = vector.multi_reduction <add>, %13, %cst_9 [1] : vector<8x32xf32> to vector<8xf32>
    %15 = vector.shape_cast %14 : vector<8xf32> to vector<8x1xf32>
    %c0_10 = arith.constant 0 : index
    %c0_11 = arith.constant 0 : index
    %16 = memref.load %arg5[%c0_10, %c0_11] : memref<1x1xf32, #tpu.memory_space<smem>>
    %17 = vector.broadcast %16 : f32 to vector<8x1xf32>
    %18 = arith.addf %15, %17 : vector<8x1xf32>
    %c0_12 = arith.constant 0 : index
    %c0_13 = arith.constant 0 : index
    %19 = vector.load %arg6[%c0_12, %c0_13] : memref<8x1xf32, #tpu.memory_space<vmem>>, vector<8x1xf32>
    tpu.vector_store %arg6[%c0_12, %c0_13], %18 {strides = array<i32>} : memref<8x1xf32, #tpu.memory_space<vmem>>, vector<8x1xf32>,
    return
  }
  func.func @transform_0(%arg0: i32) -> (i32, i32) {
    %c0_i32 = arith.constant 0 : i32
    %c0_i32_0 = arith.constant 0 : i32
    return %arg0, %c0_i32 : i32, i32
  }
  func.func @transform_1(%arg0: i32) -> (i32, i32) {
    %c0_i32 = arith.constant 0 : i32
    %c0_i32_0 = arith.constant 0 : i32
    %c0_i32_1 = arith.constant 0 : i32
    return %c0_i32, %c0_i32_0 : i32, i32
  }
  func.func @transform_2(%arg0: i32) -> (i32, i32) {
    %c0_i32 = arith.constant 0 : i32
    %c0_i32_0 = arith.constant 0 : i32
    %c0_i32_1 = arith.constant 0 : i32
    return %c0_i32, %c0_i32_0 : i32, i32
  }
  func.func @transform_3(%arg0: i32) -> (i32, i32) {
    %c0_i32 = arith.constant 0 : i32
    %c0_i32_0 = arith.constant 0 : i32
    %c0_i32_1 = arith.constant 0 : i32
    return %c0_i32, %c0_i32_0 : i32, i32
  }
  func.func @transform_4(%arg0: i32) -> (i32, i32) {
    %c0_i32 = arith.constant 0 : i32
    %c0_i32_0 = arith.constant 0 : i32
    %c0_i32_1 = arith.constant 0 : i32
    return %c0_i32, %c0_i32_0 : i32, i32
  }
  func.func @transform_5(%arg0: i32) -> (i32, i32) {
    %c0_i32 = arith.constant 0 : i32
    %c0_i32_0 = arith.constant 0 : i32
    return %arg0, %c0_i32 : i32, i32
  }
}

</mosaic_0001>

<bundles_post_ra>
// kernel: tpu_custom_call.1
= control target key start
LH: loop header
LB: loop body
LE: loop exit
PB: predicated region body
PF: predicated region fallthrough
CT: control target
= control target key end

     0   :  { %11 = vsyncpa [#allocation4], 0  ;;  %s308_s0 = inlined_call_operand.hbm [shape: f32[8,16], index: 0, kind: input, shape index: {}]   ;;  %s309_s1 = inlined_call_operand.hbm [shape: f32[16,32], index: 1, kind: input, shape index: {}]   ;;  %s310_s2 = inlined_call_operand.vmem [shape: f32[1,32], index: 2, kind: input, shape index: {}]   ;;  %s311_s3 = inlined_call_operand.vmem [shape: f32[1,32], index: 3, kind: input, shape index: {}]   ;;  %s312_s4 = inlined_call_operand.<no memory space> [shape: f32[1,1], index: 4, kind: input, shape index: {}]   ;;  %s313_s5 = inlined_call_operand.vmem [shape: f32[8,1], index: 5, kind: output, shape index: {}]  }
   0x1   :  { %12 = vsyncpa [#allocation6], 0  ;;  %s228_s18 = smov [#allocation3]   ;;  %s229_s20 = smov [#allocation5]  }
   0x2   :  { %s19_s19 = sshll.u32 %s228_s18, 4  ;;  %s28_s21 = sshll.u32 %s229_s20, 4  ;;  %s20_s19 = int_to_ptr.vmem [resolvable:$true] %s19_s19  ;;  %s265_s21 = int_to_ptr.vmem [resolvable:$true] %s28_s21 }
   0x3   :  { %s180_s24 = scalar_lea.hbm %s308_s0, 128 }
   0x4   :  { %p181_p0 = scmp.ne.s32.totalorder %s308_s0, %s180_s24  ;;  %p184_p1 = scmp.lt.u32.totalorder %s180_s24, %s308_s0 }
   0x6   :  { %p186_p2 = pnand %p184_p1, %p181_p0 }
   0x8   :  { %189 = shalt.err (!%p186_p2)
}
   0x9   :  { %s190_s29 = scalar_lea.vmem %s20_s19, 128  ;;  %p195_p4 = scmp.lt.s32.totalorder %s20_s19, %s20_s19 }
   0xa   :  { %p191_p3 = scmp.ne.s32.totalorder %s20_s19, %s190_s29  ;;  %p196_p5 = scmp.lt.s32.totalorder %s190_s29, %s190_s29 }
   0xc   :  { %p197_p6 = por %p196_p5, %p195_p4 }
   0xe   :  { %p198_p7 = pnand %p197_p6, %p191_p3 }
  0x10   :  { %201 = shalt.err (!%p198_p7)
}
  0x11   :  { %22 = dma.hbm_to_vmem [thread:$0]  %s308_s0, 128, %s20_s19, [#allocation4]  }
  0x12   :  { %s202_s9 = scalar_lea.hbm %s309_s1, 256 }
  0x13   :  { %p203_p8 = scmp.ne.s32.totalorder %s309_s1, %s202_s9  ;;  %p206_p9 = scmp.lt.u32.totalorder %s202_s9, %s309_s1 }
  0x15   :  { %p208_p10 = pnand %p206_p9, %p203_p8 }
  0x17   :  { %211 = shalt.err (!%p208_p10)
}
  0x18   :  { %s212_s14 = scalar_lea.vmem %s265_s21, 256  ;;  %p217_p12 = scmp.lt.s32.totalorder %s265_s21, %s265_s21 }
  0x19   :  { %p213_p11 = scmp.ne.s32.totalorder %s265_s21, %s212_s14  ;;  %p218_p13 = scmp.lt.s32.totalorder %s212_s14, %s212_s14 }
  0x1b   :  { %p219_p0 = por %p218_p13, %p217_p12 }
  0x1d   :  { %p220_p1 = pnand %p219_p0, %p213_p11 }
  0x1f   :  { %223 = shalt.err (!%p220_p1)
}
  0x20   :  { %s230_s0 = smov 128   ;;  %s231_s15 = smov 8  }
  0x21   :  { %34 = dma.hbm_to_vmem [thread:$0]  %s309_s1, 256, %s265_s21, [#allocation6], %s230_s0, %s230_s0, %s231_s15  }
  0x22   :  { %224 = dma.done.wait [#allocation4], 128  }
  0x23   :  { %225 = vsyncadd [#allocation4], 4294967168 }
  0x24   :  { %226 = dma.done.wait [#allocation6], 256  }
  0x25   :  { %227 = vsyncadd [#allocation6], 4294967040  ;;  %v232_v0 = vmov 0.0|0.0   ;;  %vm233_vm0 = vmmov 0   ;;  %v234_v1 = vmov 0.0   ;;  %v48_v2 = vld [vmem:[#allocation5] sm:$0xff]  ;;  %v147_v15 = vstv %s312_s4 }
  0x26   :  { %170 = vmatprep.subr.bf16.mxu0 %v232_v0  ;;  %167 = vmatprep.mubr.msk.f32.mxu0 %vm233_vm0, %v234_v1  ;;  %v49_v3 = vld [vmem:[#allocation5 + $0x8] sm:$0xff]  ;;  %v47_v5 = vld [vmem:[#allocation3] sm:$0xff]  ;;  %vm57_vm1 = vcmask 130048   ;;  %vm142_vm3 = vcmask 261120   ;;  %vm149_vm4 = vcmask 7168  }
  0x27   :  { %v171_v4 = vpack.c.bf16 %v49_v3, %v48_v2  ;;  %v157_v6 = vld [vmem:[%s310_s2] ss:$0 sm:$0xff] }
  0x28   :  { %v159_v11 = vld [vmem:[%s311_s3] ss:$0 sm:$0xff] }
  0x29   :  { %172 = vmatpush3.bf16.msra.mxu0 %v171_v4 }
  0x2c   :  { %168 = vmatmul.mubr.msk.f32.vlgmr.msra.gmra.mrb[0].mxu0 %vm57_vm1, %v47_v5 }
  0xff   :  { %v127_v7 = vpop.f32.mrb[0].mxu0 }
 0x100   :  { %v128_v8 = vadd.f32 %v157_v6, %v127_v7  ;;  %v169_v9 = vpop.f32.mrb[1].mxu0 }
 0x102   :  { %v132_v10 = vmul.f32 0.01, %v128_v8  ;;  %vm131_vm2 = vcmp.gt.f32.partialorder %v128_v8, 0.0 }
 0x104   :  { %v133_v12 = vsel %vm131_vm2, %v128_v8, %v132_v10 }
 0x105   :  { %v141_v13 = vmul.f32 %v159_v11, %v133_v12 }
 0x107   :  { %v143_v14 = vsel %vm142_vm3, %v141_v13, 0.0 }
 0x108   :  { %144 = vadd.xlane.f32.xlu0 %v143_v14 }
 0x195   :  { %v145_v16 = vpop.xlane.xlu0 %144 }
 0x196   :  { %v148_v17 = vadd.f32 %v147_v15, %v145_v16 }
 0x198   :  { %150 = vst.msk [vmem:[%s313_s5] sm:$0xff] %vm149_vm4, %v148_v17 }
 0x199   :  { %155 = vsyncpa [#allocation4], 1 }
 0x19a   :  { %156 = vsyncpa [#allocation6], 1 }

</bundles_post_ra>
